<compile_context>
chip_gen: v7x
topology: tpu7x:2x2x1
jax: 0.10.0
libtpu: 0.0.40
codegen_flags: <defaults>
</compile_context>

<pallas_src>
import functools

import numpy as np

import jax
import jax.numpy as jnp
from jax.experimental import pallas as pl
from jax.experimental.pallas import tpu as pltpu

LN_EPS = 1e-5  # torch.nn.LayerNorm default eps


def _round_up(x, m):
    return ((x + m - 1) // m) * m


def mlp_head_kernel(x_ref, gamma_ref, beta_ref, w_ref, b_ref, o_ref, *, mxu_dtype):
    """Fused LayerNorm(C_in) + Linear(C_in -> C_out) on one (TB, TN) tile.

    x_ref:     (TB, C_in)   input rows for this batch tile
    gamma_ref: (1,  C_in)   LayerNorm weight
    beta_ref:  (1,  C_in)   LayerNorm bias
    w_ref:     (TN, C_in)   Linear weight tile (PyTorch layout, pre-cast to mxu_dtype)
    b_ref:     (1,  TN)     Linear bias tile
    o_ref:     (TB, TN)     output tile
    """
    x = x_ref[...].astype(jnp.float32)

    # LayerNorm over C_in, biased variance (PyTorch semantics), statistics in f32.
    mean = jnp.mean(x, axis=-1, keepdims=True)
    centered = x - mean
    var = jnp.mean(centered * centered, axis=-1, keepdims=True)
    xn = centered * jax.lax.rsqrt(var + LN_EPS)
    y = xn * gamma_ref[...].astype(jnp.float32) + beta_ref[...].astype(jnp.float32)

    # Linear: contract C_in of y with C_in of W. Weight stays in (C_out, C_in)
    # layout (no transpose materialized); MXU operands in mxu_dtype, f32 acc.
    out = jax.lax.dot_general(
        y.astype(mxu_dtype), w_ref[...],
        dimension_numbers=(((1,), (1,)), ((), ())),
        preferred_element_type=jnp.float32)
    out = out + b_ref[...].astype(jnp.float32)

    o_ref[...] = out.astype(o_ref.dtype)


def mlp_head(x, ln_weight, ln_bias, lin_weight, lin_bias, *, mxu_dtype=jnp.bfloat16):
    """x: (B, C_in); lin_weight: (C_out, C_in) [PyTorch layout]; returns (B, C_out)."""
    B, C_in = x.shape
    C_out = lin_weight.shape[0]

    mxu_dtype = np.dtype(mxu_dtype)
    x_bytes = x.dtype.itemsize
    w_bytes = mxu_dtype.itemsize
    out_bytes = x_bytes

    # Sublane multiple for the batch axis (8 for f32, 16 for bf16, ...).
    sub = max(8, 32 // x_bytes)

    # ---- tile selection --------------------------------------------------
    # Out-channel tile: multiple of 128 (lane-dense stores); weight tile kept
    # under ~8 MiB per buffer so double-buffering fits even v7x's 64 MiB VMEM.
    c_out_pad = _round_up(C_out, 128)
    tn_budget = max(128, ((8 << 20) // max(1, C_in * w_bytes)) // 128 * 128)
    tn = min(c_out_pad, tn_budget)

    # Batch tile: big (amortize per-step overhead) but a few MiB per buffer.
    tb_cap = min(
        512,
        ((4 << 20) // max(1, C_in * x_bytes)) // sub * sub,
        ((4 << 20) // max(1, tn * out_bytes)) // sub * sub,
    )
    tb_cap = max(sub, tb_cap)
    b_pad = _round_up(B, sub)
    tb = min(b_pad, tb_cap)

    grid = (pl.cdiv(b_pad, tb), pl.cdiv(c_out_pad, tn))

    # ---- parameter prep (glue, outside the hot loop) ----------------------
    x_p = jnp.pad(x, ((0, b_pad - B), (0, 0))) if b_pad != B else x
    gamma = ln_weight.reshape(1, C_in)
    beta = ln_bias.reshape(1, C_in)
    # Keep PyTorch (C_out, C_in) layout; pad out-channels; pre-cast to MXU dtype.
    w_p = jnp.pad(lin_weight, ((0, c_out_pad - C_out), (0, 0))).astype(mxu_dtype)
    b_p = jnp.pad(lin_bias, (0, c_out_pad - C_out)).reshape(1, c_out_pad)

    # ---- VMEM budget (double-buffered tiled operands + small params) ------
    vmem_est = (2 * tb * C_in * x_bytes        # x tiles
                + 2 * tb * tn * out_bytes      # output tiles
                + 2 * tn * C_in * w_bytes      # weight tiles
                + 4 * C_in * 4                 # gamma, beta
                + 2 * tn * 4)                  # bias
    vmem_limit = int(min(max(int(vmem_est * 1.5) + (2 << 20), 32 << 20), 64 << 20))

    flops = 2 * b_pad * C_in * c_out_pad
    bytes_accessed = (b_pad * C_in * x_bytes + c_out_pad * C_in * w_bytes
                      + 2 * C_in * 4 + c_out_pad * 4 + b_pad * c_out_pad * out_bytes)

    out = pl.pallas_call(
        functools.partial(mlp_head_kernel, mxu_dtype=mxu_dtype),
        out_shape=jax.ShapeDtypeStruct((b_pad, c_out_pad), x.dtype),
        grid=grid,
        in_specs=[
            pl.BlockSpec((tb, C_in), lambda i, j: (i, 0)),   # x: tiles over batch
            pl.BlockSpec((1, C_in), lambda i, j: (0, 0)),    # gamma: resident
            pl.BlockSpec((1, C_in), lambda i, j: (0, 0)),    # beta: resident
            pl.BlockSpec((tn, C_in), lambda i, j: (j, 0)),   # W: tiles over C_out
            pl.BlockSpec((1, tn), lambda i, j: (0, j)),      # bias: tiles over C_out
        ],
        out_specs=pl.BlockSpec((tb, tn), lambda i, j: (i, j)),
        compiler_params=pltpu.CompilerParams(
            dimension_semantics=("parallel", "parallel"),
            vmem_limit_bytes=vmem_limit),
        cost_estimate=pl.CostEstimate(
            flops=flops, transcendentals=0, bytes_accessed=bytes_accessed),
    )(x_p, gamma, beta, w_p, b_p)

    return out[:B, :C_out]


def reference_mlp_head(x, ln_weight, ln_bias, lin_weight, lin_bias):
    """Pure-JAX reference matching PyTorch semantics (f32 throughout)."""
    mean = jnp.mean(x, axis=-1, keepdims=True)
    var = jnp.mean((x - mean) ** 2, axis=-1, keepdims=True)
    xn = (x - mean) / jnp.sqrt(var + LN_EPS)
    y = xn * ln_weight + ln_bias
    return y @ lin_weight.T + lin_bias


def _make_params(key, B, C_in, C_out):
    k_x, k_w, k_b = jax.random.split(key, 3)
    x = jax.random.normal(k_x, (B, C_in), dtype=jnp.float32)
    ln_weight = jnp.ones((C_in,), dtype=jnp.float32)   # LayerNorm default init
    ln_bias = jnp.zeros((C_in,), dtype=jnp.float32)
    bound = 1.0 / (C_in ** 0.5)
    lin_weight = jax.random.uniform(k_w, (C_out, C_in),
                                    minval=-bound, maxval=bound, dtype=jnp.float32)
    lin_bias = jax.random.uniform(k_b, (C_out,),
                                  minval=-bound, maxval=bound, dtype=jnp.float32)
    return x, ln_weight, ln_bias, lin_weight, lin_bias


if __name__ == "__main__":
    key = jax.random.PRNGKey(0)
    k1, k2 = jax.random.split(key)

    # 1) Module-sized small case (batch=8, in_channels=32, out_channels=16).
    args = _make_params(k1, 8, 32, 16)
    ref = reference_mlp_head(*args)

    out_f32 = jax.block_until_ready(mlp_head(*args, mxu_dtype=jnp.float32))
    assert out_f32.shape == (8, 16)
    assert jnp.allclose(out_f32, ref, atol=1e-5, rtol=1e-5), "f32 MXU mismatch"

    out_bf16 = jax.block_until_ready(mlp_head(*args))  # default: bf16 MXU operands
    assert out_bf16.shape == (8, 16)
    assert jnp.allclose(out_bf16, ref, atol=2e-2, rtol=2e-2), "bf16 MXU mismatch"

    # 2) Larger, non-aligned case to exercise batch / out-channel padding + tiling.
    args2 = _make_params(k2, 50, 256, 200)
    ref2 = reference_mlp_head(*args2)

    out2_f32 = jax.block_until_ready(mlp_head(*args2, mxu_dtype=jnp.float32))
    assert out2_f32.shape == (50, 200)
    assert jnp.allclose(out2_f32, ref2, atol=1e-4, rtol=1e-4), "f32 MXU mismatch (padded)"

    out2_bf16 = jax.block_until_ready(mlp_head(*args2))
    assert out2_bf16.shape == (50, 200)
    assert jnp.allclose(out2_bf16, ref2, atol=5e-2, rtol=5e-2), "bf16 MXU mismatch (padded)"

    print("KERNEL_OK")
</pallas_src>

<mosaic_0001>
module attributes {stable_mosaic.version = 11 : i64} {
  func.func @mlp_head_kernel(%arg0: i32, %arg1: i32, %arg2: memref<8x32xf32, #tpu.memory_space<vmem>>, %arg3: memref<1x32xf32, #tpu.memory_space<vmem>>, %arg4: memref<1x32xf32, #tpu.memory_space<vmem>>, %arg5: memref<128x32xf32, #tpu.memory_space<vmem>>, %arg6: memref<1x128xf32, #tpu.memory_space<vmem>>, %arg7: memref<8x128xf32, #tpu.memory_space<vmem>>) attributes {dimension_semantics = [#tpu.dimension_semantics<parallel>, #tpu.dimension_semantics<parallel>], iteration_bounds = array<i64: 1, 1>, scalar_prefetch = 0 : i64, scratch_operands = 0 : i64, tpu.core_type = #tpu.core_type<tc>, window_params = [{transform_indices = @transform_0, window_bounds = array<i64: 8, 32>}, {pipeline_mode = #tpu.pipeline_mode<synchronous>, transform_indices = @transform_1, window_bounds = array<i64: 1, 32>}, {pipeline_mode = #tpu.pipeline_mode<synchronous>, transform_indices = @transform_2, window_bounds = array<i64: 1, 32>}, {transform_indices = @transform_3, window_bounds = array<i64: 128, 32>}, {transform_indices = @transform_4, window_bounds = array<i64: 1, 128>}, {transform_indices = @transform_5, window_bounds = array<i64: 8, 128>}]} {
    %c0 = arith.constant 0 : index
    %c0_0 = arith.constant 0 : index
    %0 = vector.load %arg2[%c0, %c0_0] : memref<8x32xf32, #tpu.memory_space<vmem>>, vector<8x32xf32>
    %cst = arith.constant dense<0.000000e+00> : vector<8xf32>
    %1 = vector.multi_reduction <add>, %0, %cst [1] : vector<8x32xf32> to vector<8xf32>
    %2 = vector.shape_cast %1 : vector<8xf32> to vector<8x1xf32>
    %cst_1 = arith.constant 3.200000e+01 : f32
    %3 = vector.broadcast %cst_1 : f32 to vector<8x1xf32>
    %4 = arith.divf %2, %3 : vector<8x1xf32>
    %5 = vector.broadcast %4 : vector<8x1xf32> to vector<8x32xf32>
    %6 = arith.subf %0, %5 : vector<8x32xf32>
    %7 = arith.mulf %6, %6 : vector<8x32xf32>
    %cst_2 = arith.constant dense<0.000000e+00> : vector<8xf32>
    %8 = vector.multi_reduction <add>, %7, %cst_2 [1] : vector<8x32xf32> to vector<8xf32>
    %9 = vector.shape_cast %8 : vector<8xf32> to vector<8x1xf32>
    %cst_3 = arith.constant 3.200000e+01 : f32
    %10 = vector.broadcast %cst_3 : f32 to vector<8x1xf32>
    %11 = arith.divf %9, %10 : vector<8x1xf32>
    %cst_4 = arith.constant 9.99999974E-6 : f32
    %12 = vector.broadcast %cst_4 : f32 to vector<8x1xf32>
    %13 = arith.addf %11, %12 : vector<8x1xf32>
    %14 = math.rsqrt %13 : vector<8x1xf32>
    %15 = vector.broadcast %14 : vector<8x1xf32> to vector<8x32xf32>
    %16 = arith.mulf %6, %15 : vector<8x32xf32>
    %c0_5 = arith.constant 0 : index
    %c0_6 = arith.constant 0 : index
    %17 = vector.load %arg3[%c0_5, %c0_6] : memref<1x32xf32, #tpu.memory_space<vmem>>, vector<1x32xf32>
    %18 = vector.broadcast %17 : vector<1x32xf32> to vector<8x32xf32>
    %19 = arith.mulf %16, %18 : vector<8x32xf32>
    %c0_7 = arith.constant 0 : index
    %c0_8 = arith.constant 0 : index
    %20 = vector.load %arg4[%c0_7, %c0_8] : memref<1x32xf32, #tpu.memory_space<vmem>>, vector<1x32xf32>
    %21 = vector.broadcast %20 : vector<1x32xf32> to vector<8x32xf32>
    %22 = arith.addf %19, %21 : vector<8x32xf32>
    %c0_9 = arith.constant 0 : index
    %c0_10 = arith.constant 0 : index
    %23 = vector.load %arg5[%c0_9, %c0_10] : memref<128x32xf32, #tpu.memory_space<vmem>>, vector<128x32xf32>
    %cst_11 = arith.constant dense<0.000000e+00> : vector<8x128xf32>
    %24 = tpu.matmul %22, %23, %cst_11 {dimension_numbers = #tpu.dot_dimension_numbers<[1], [1], [0], [0], [0, 0, 1, 0], [], []>} : vector<8x32xf32>, vector<128x32xf32>, vector<8x128xf32> -> vector<8x128xf32>
    %c0_12 = arith.constant 0 : index
    %c0_13 = arith.constant 0 : index
    %25 = vector.load %arg6[%c0_12, %c0_13] : memref<1x128xf32, #tpu.memory_space<vmem>>, vector<1x128xf32>
    %26 = vector.broadcast %25 : vector<1x128xf32> to vector<8x128xf32>
    %27 = arith.addf %24, %26 : vector<8x128xf32>
    %c0_14 = arith.constant 0 : index
    %c0_15 = arith.constant 0 : index
    %28 = vector.load %arg7[%c0_14, %c0_15] : memref<8x128xf32, #tpu.memory_space<vmem>>, vector<8x128xf32>
    tpu.vector_store %arg7[%c0_14, %c0_15], %27 {strides = array<i32>} : memref<8x128xf32, #tpu.memory_space<vmem>>, vector<8x128xf32>,
    return
  }
  func.func @transform_0(%arg0: i32, %arg1: i32) -> (i32, i32) {
    %c0_i32 = arith.constant 0 : i32
    %c0_i32_0 = arith.constant 0 : i32
    return %arg0, %c0_i32 : i32, i32
  }
  func.func @transform_1(%arg0: i32, %arg1: i32) -> (i32, i32) {
    %c0_i32 = arith.constant 0 : i32
    %c0_i32_0 = arith.constant 0 : i32
    %c0_i32_1 = arith.constant 0 : i32
    return %c0_i32, %c0_i32_0 : i32, i32
  }
  func.func @transform_2(%arg0: i32, %arg1: i32) -> (i32, i32) {
    %c0_i32 = arith.constant 0 : i32
    %c0_i32_0 = arith.constant 0 : i32
    %c0_i32_1 = arith.constant 0 : i32
    return %c0_i32, %c0_i32_0 : i32, i32
  }
  func.func @transform_3(%arg0: i32, %arg1: i32) -> (i32, i32) {
    %c0_i32 = arith.constant 0 : i32
    %c0_i32_0 = arith.constant 0 : i32
    return %arg1, %c0_i32 : i32, i32
  }
  func.func @transform_4(%arg0: i32, %arg1: i32) -> (i32, i32) {
    %c0_i32 = arith.constant 0 : i32
    %c0_i32_0 = arith.constant 0 : i32
    return %c0_i32, %arg1 : i32, i32
  }
  func.func @transform_5(%arg0: i32, %arg1: i32) -> (i32, i32) {
    %c0_i32 = arith.constant 0 : i32
    return %arg0, %arg1 : i32, i32
  }
}

</mosaic_0001>

<bundles_post_ra>
// kernel: tpu_custom_call.1
= control target key start
LH: loop header
LB: loop body
LE: loop exit
PB: predicated region body
PF: predicated region fallthrough
CT: control target
= control target key end

     0   :  { %vm22_vm0 = vcmask 261120   ;;  %s477_s0 = inlined_call_operand.vmem [shape: f32[8,32], index: 0, kind: input, shape index: {}]   ;;  %s478_s1 = inlined_call_operand.vmem [shape: f32[1,32], index: 1, kind: input, shape index: {}]   ;;  %s479_s2 = inlined_call_operand.vmem [shape: f32[1,32], index: 2, kind: input, shape index: {}]   ;;  %s480_s3 = inlined_call_operand.vmem [shape: f32[128,32], index: 3, kind: input, shape index: {}]   ;;  %s481_s4 = inlined_call_operand.vmem [shape: f32[1,128], index: 4, kind: input, shape index: {}]   ;;  %s482_s5 = inlined_call_operand.hbm [shape: f32[8,128], index: 5, kind: output, shape index: {}]  }
   0x1   :  { %v21_v0 = vld [vmem:[%s477_s0] sm:$0xff] }
   0x2   :  { %10 = vsyncpa [#allocation3], 0  ;;  %v23_v1 = vsel %vm22_vm0, %v21_v0, 0.0  ;;  %v53_v3 = vld [vmem:[%s480_s3] sm:$0xff]  ;;  %v54_v4 = vld [vmem:[%s480_s3 + $0x8] sm:$0xff]  ;;  %v346_v5 = vmov 0.0|0.0  }
   0x3   :  { %24 = vadd.xlane.f32.xlu0 %v23_v1  ;;  %vm386_vm1 = vmpackc.low %vm22_vm0, %vm22_vm0  ;;  %284 = vmatprep.subr.bf16.mxu0 %v346_v5  ;;  %v285_v6 = vpack.c.bf16 %v54_v4, %v53_v3  ;;  %v55_v7 = vld [vmem:[%s480_s3 + $0x10] sm:$0xff]  ;;  %v56_v8 = vld [vmem:[%s480_s3 + $0x18] sm:$0xff]  ;;  %vm347_vm2 = vmmov 0   ;;  %v348_v30 = vmov 0.0   ;;  %s349_s30 = smov [#allocation2]  }
   0x4   :  { %v289_v9 = vpack.c.bf16 %v56_v8, %v55_v7  ;;  %v57_v10 = vld [vmem:[%s480_s3 + $0x20] sm:$0xff]  ;;  %v58_v11 = vld [vmem:[%s480_s3 + $0x28] sm:$0xff]  ;;  %v59_v13 = vld [vmem:[%s480_s3 + $0x30] sm:$0xff]  ;;  %281 = vmatprep.mubr.msk.f32.mxu0 %vm347_vm2, %v348_v30  ;;  %s204_s6 = sshll.u32 %s349_s30, 4  ;;  %s205_s6 = int_to_ptr.vmem [resolvable:$true] %s204_s6 }
   0x5   :  { %287 = vmatpush3.bf16.xpose.msk.msra.mxu0 %vm386_vm1, %v285_v6  ;;  %v293_v12 = vpack.c.bf16 %v58_v11, %v57_v10  ;;  %v60_v14 = vld [vmem:[%s480_s3 + $0x38] sm:$0xff]  ;;  %v61_v16 = vld [vmem:[%s480_s3 + $0x40] sm:$0xff]  ;;  %v62_v17 = vld [vmem:[%s480_s3 + $0x48] sm:$0xff]  ;;  %p327_p1 = scmp.lt.s32.totalorder %s205_s6, %s205_s6 }
   0x6   :  { %288 = vmatprep.subr.bf16.mxu0 %v346_v5  ;;  %v297_v15 = vpack.c.bf16 %v60_v14, %v59_v13  ;;  %v301_v18 = vpack.c.bf16 %v62_v17, %v61_v16  ;;  %v63_v19 = vld [vmem:[%s480_s3 + $0x50] sm:$0xff]  ;;  %v64_v20 = vld [vmem:[%s480_s3 + $0x58] sm:$0xff]  ;;  %v65_v27 = vld [vmem:[%s480_s3 + $0x60] sm:$0xff] }
   0x7   :  { %v305_v21 = vpack.c.bf16 %v64_v20, %v63_v19  ;;  %v66_v28 = vld [vmem:[%s480_s3 + $0x68] sm:$0xff]  ;;  %v67_v31 = vld [vmem:[%s480_s3 + $0x70] sm:$0xff]  ;;  %v68_v32 = vld [vmem:[%s480_s3 + $0x78] sm:$0xff] }
   0x8   :  { %v309_v29 = vpack.c.bf16 %v66_v28, %v65_v27  ;;  %v313_v33 = vpack.c.bf16 %v68_v32, %v67_v31  ;;  %v212_v38 = vld [vmem:[%s478_s1] ss:$0 sm:$0xff]  ;;  %s322_s1 = scalar_lea.vmem %s205_s6, 128 }
   0x9   :  { %v213_v40 = vld [vmem:[%s479_s2] ss:$0 sm:$0xff]  ;;  %p323_p0 = scmp.ne.s32.totalorder %s205_s6, %s322_s1  ;;  %p328_p2 = scmp.lt.s32.totalorder %s322_s1, %s322_s1 }
   0xa   :  { %v214_v43 = vld [vmem:[%s481_s4] ss:$0 sm:$0xff] }
   0xb   :  { %p329_p3 = por %p328_p2, %p327_p1 }
   0xd   :  { %291 = vmatpush3.bf16.xpose.msk.msra.mxu0 %vm386_vm1, %v289_v9  ;;  %p330_p4 = pnand %p329_p3, %p323_p0 }
   0xe   :  { %292 = vmatprep.subr.bf16.mxu0 %v346_v5 }
  0x15   :  { %295 = vmatpush3.bf16.xpose.msk.msra.mxu0 %vm386_vm1, %v293_v12 }
  0x16   :  { %296 = vmatprep.subr.bf16.mxu0 %v346_v5 }
  0x1d   :  { %299 = vmatpush3.bf16.xpose.msk.msra.mxu0 %vm386_vm1, %v297_v15 }
  0x1e   :  { %300 = vmatprep.subr.bf16.mxu0 %v346_v5 }
  0x25   :  { %303 = vmatpush3.bf16.xpose.msk.msra.mxu0 %vm386_vm1, %v301_v18 }
  0x26   :  { %304 = vmatprep.subr.bf16.mxu0 %v346_v5 }
  0x2d   :  { %307 = vmatpush3.bf16.xpose.msk.msra.mxu0 %vm386_vm1, %v305_v21 }
  0x2e   :  { %308 = vmatprep.subr.bf16.mxu0 %v346_v5 }
  0x35   :  { %311 = vmatpush3.bf16.xpose.msk.msra.mxu0 %vm386_vm1, %v309_v29 }
  0x36   :  { %312 = vmatprep.subr.bf16.mxu0 %v346_v5 }
  0x3d   :  { %315 = vmatpush3.bf16.xpose.msk.msra.mxu0 %vm386_vm1, %v313_v33 }
  0x90   :  { %v25_v22 = vpop.xlane.xlu0 %24 }
  0x91   :  { %v27_v23 = vmul.f32 0.03125, %v25_v22 }
  0x93   :  { %v28_v24 = vsub.f32 %v21_v0, %v27_v23 }
  0x95   :  { %v29_v25 = vmul.f32 %v28_v24, %v28_v24 }
  0x97   :  { %v30_v26 = vsel %vm22_vm0, %v29_v25, 0.0 }
  0x98   :  { %31 = vadd.xlane.f32.xlu0 %v30_v26 }
 0x125   :  { %v32_v34 = vpop.xlane.xlu0 %31 }
 0x126   :  { %v33_v35 = vmul.f32 0.03125, %v32_v34 }
 0x128   :  { %v34_v36 = vadd.f32 1e-05, %v33_v35 }
 0x12a   :  { %320 = vrsqrt.f32 %v34_v36 }
 0x134   :  { %v321_v37 = vpop.eup %320 }
 0x135   :  { %v36_v39 = vmul.f32 %v321_v37, %v28_v24 }
 0x137   :  { %v44_v41 = vmul.f32 %v212_v38, %v36_v39 }
 0x139   :  { %v52_v42 = vadd.f32 %v213_v40, %v44_v41 }
 0x13b   :  { %282 = vmatmul.mubr.msk.f32.vlgmr.msra.gmra.mrb[0].mxu0 %vm22_vm0, %v52_v42 }
 0x20e   :  { %v193_v44 = vpop.f32.mrb[0].mxu0 }
 0x20f   :  { %v194_v45 = vadd.f32 %v214_v43, %v193_v44  ;;  %v283_v46 = vpop.f32.mrb[1].mxu0 }
 0x211   :  { %197 = vst [vmem:[#allocation2] sm:$0xff] %v194_v45 }
 0x212   :  { %333 = shalt.err (!%p330_p4)
}
 0x213   :  { %s334_s8 = scalar_lea.hbm %s482_s5, 128 }
 0x214   :  { %p335_p5 = scmp.ne.s32.totalorder %s482_s5, %s334_s8  ;;  %p338_p6 = scmp.lt.u32.totalorder %s334_s8, %s482_s5 }
 0x216   :  { %p340_p7 = pnand %p338_p6, %p335_p5 }
 0x218   :  { %343 = shalt.err (!%p340_p7)
}
 0x219   :  { %207 = dma.vmem_to_hbm [thread:$0]  %s205_s6, 128, %s482_s5, [#allocation3]  }
 0x21a   :  { %344 = dma.done.wait [#allocation3], 128  }
 0x21b   :  { %345 = vsyncadd [#allocation3], 4294967168 }
 0x21c   :  { %211 = vsyncpa [#allocation3], 1 }

</bundles_post_ra>
